<compile_context>
chip_gen: v7x
topology: tpu7x:2x2x1
jax: 0.10.0
libtpu: 0.0.40
codegen_flags: <defaults>
</compile_context>

<pallas_src>
import math

import jax
import jax.numpy as jnp
import numpy as np
from jax.experimental import pallas as pl
from jax.experimental.pallas import tpu as pltpu  # noqa: F401  (TPU backend)

# ----------------------------- problem sizes ------------------------------
B = 2      # batch
S = 8      # sequence length (power of two -> bitmask batch-index trick below)
D = 32     # d_model (features)
H = 4      # number of heads
DK = D // H
F = 64     # d_ff
EPS = 1e-6
BS = B * S
HD = H * D  # 128: per-head fused weights packed lane-dense


def _layernorm(x2, alpha, beta):
    # x2: (BS, D); alpha/beta: (1, D). PyTorch .std() uses ddof=1, eps on std.
    mean = jnp.mean(x2, axis=-1, keepdims=True)
    diff = x2 - mean
    var = jnp.sum(diff * diff, axis=-1, keepdims=True) * (1.0 / (D - 1))
    std = jnp.sqrt(var)
    inv = pl.reciprocal(std + EPS, approx=False)        # EUP slot, exact-ish
    return alpha * (diff * inv) + beta


def encoder_block_kernel(
    x_ref,      # (BS, D)   activations
    keep_ref,   # (1, BS)   per-key keep mask (nonzero = attend), per batch col
    wqkt_ref,   # (D, HD)   per-head  Wq_h @ Wk_h^T / sqrt(dk), lane-dense
    wvo_ref,    # (D, HD)   per-head  Wv_h @ Wo_rows_h,         lane-dense
    w1_ref,     # (D, F)
    w2_ref,     # (F, D)
    vecs_ref,   # (8, 128)  rows: ln1 a, ln1 b, ln2 a, ln2 b, ffn b2, ffn b1
    o_ref,      # (BS, D)
):
    x = x_ref[...]
    a1 = vecs_ref[0:1, 0:D]
    g1 = vecs_ref[1:2, 0:D]
    a2 = vecs_ref[2:3, 0:D]
    g2 = vecs_ref[3:4, 0:D]
    b2 = vecs_ref[4:5, 0:D]
    b1 = vecs_ref[5:6, 0:F]

    # Block-diagonal additive mask bias built in-kernel (no (BS,BS) HBM input).
    rowi = jax.lax.broadcasted_iota(jnp.int32, (BS, BS), 0)
    coli = jax.lax.broadcasted_iota(jnp.int32, (BS, BS), 1)
    blk = jnp.int32(-S)                       # ~(S-1): S is a power of two
    same_batch = (rowi & blk) == (coli & blk)
    keep = keep_ref[...] != 0.0               # (1, BS) bool, broadcast over rows
    bias = jnp.where(same_batch & keep, 0.0, -1e9)   # (BS, BS)

    # ---------------- residual connection 0: self-attention ----------------
    xn = _layernorm(x, a1, g1)                                        # (BS, D)
    xnT = xn.T                                                        # (D, BS), one shared transpose
    qW = jnp.dot(xn, wqkt_ref[...], preferred_element_type=jnp.float32)  # (BS, HD)
    vW = jnp.dot(xn, wvo_ref[...], preferred_element_type=jnp.float32)   # (BS, HD)

    attn = jnp.zeros((BS, D), jnp.float32)
    for hh in range(H):                                               # static loop
        lo = hh * D
        s = jnp.dot(qW[:, lo:lo + D], xnT,
                    preferred_element_type=jnp.float32) + bias        # (BS, BS)
        s = s - jnp.max(s, axis=-1, keepdims=True)
        e = jnp.exp(s)
        p = e * pl.reciprocal(jnp.sum(e, axis=-1, keepdims=True), approx=False)
        attn = attn + jnp.dot(p, vW[:, lo:lo + D],
                              preferred_element_type=jnp.float32)     # (BS, D)
    x1 = x + attn                                                     # residual

    # ---------------- residual connection 1: feed-forward -------------------
    x1n = _layernorm(x1, a2, g2)
    h1 = jnp.dot(x1n, w1_ref[...], preferred_element_type=jnp.float32) + b1
    h1 = jnp.maximum(h1, 0.0)                                         # ReLU
    ff = jnp.dot(h1, w2_ref[...], preferred_element_type=jnp.float32) + b2

    o_ref[...] = x1 + ff


def pack_params(params):
    """One-time weight fusion/packing, hoisted OUT of the per-call jit path."""
    (wq, wk, wv, wo, a1, g1, a2, g2, w1, b1, w2, b2) = params
    scale = 1.0 / math.sqrt(DK)

    wqkt_blocks, wvo_blocks = [], []
    for hh in range(H):
        lo = hh * DK
        # s_h = (xn Wq_h)(xn Wk_h)^T = xn (Wq_h Wk_h^T) xn^T  (scale folded in)
        wqkt_blocks.append((wq[:, lo:lo + DK] @ wk[:, lo:lo + DK].T) * scale)
        # attn = sum_h p_h (xn Wv_h) Wo_rows_h = sum_h p_h (xn (Wv_h Wo_rows_h))
        wvo_blocks.append(wv[:, lo:lo + DK] @ wo[lo:lo + DK, :])
    wqkt = jnp.concatenate(wqkt_blocks, axis=1).astype(jnp.float32)   # (D, HD)
    wvo = jnp.concatenate(wvo_blocks, axis=1).astype(jnp.float32)     # (D, HD)

    vecs = jnp.zeros((8, 128), jnp.float32)                           # one f32 vreg tile
    vecs = vecs.at[0, :D].set(a1.reshape(D))
    vecs = vecs.at[1, :D].set(g1.reshape(D))
    vecs = vecs.at[2, :D].set(a2.reshape(D))
    vecs = vecs.at[3, :D].set(g2.reshape(D))
    vecs = vecs.at[4, :D].set(b2.reshape(D))
    vecs = vecs.at[5, :F].set(b1.reshape(F))

    packed = (wqkt, wvo, w1.astype(jnp.float32), w2.astype(jnp.float32), vecs)
    return tuple(jax.device_put(jnp.asarray(t)) for t in packed)


@jax.jit
def encoder_block(x, src_mask, packed):
    wqkt, wvo, w1, w2, vecs = packed
    x2 = x.reshape(BS, D)
    keep = src_mask[:, 0, :].reshape(1, BS).astype(jnp.float32)       # tiny, per-call

    out2 = pl.pallas_call(
        encoder_block_kernel,
        out_shape=jax.ShapeDtypeStruct((BS, D), jnp.float32),
    )(x2, keep, wqkt, wvo, w1, w2, vecs)
    return out2.reshape(B, S, D)


# ------------------------- plain-JAX reference -----------------------------
def encoder_block_ref(x, src_mask, params):
    (wq, wk, wv, wo, a1, g1, a2, g2, w1, b1, w2, b2) = params

    def ln(t, alpha, beta):
        mean = jnp.mean(t, axis=-1, keepdims=True)
        diff = t - mean
        var = jnp.sum(diff * diff, axis=-1, keepdims=True) / (D - 1)
        return alpha * diff / (jnp.sqrt(var) + EPS) + beta

    xn = ln(x, a1, g1)
    q = xn @ wq
    k = xn @ wk
    v = xn @ wv
    qh = q.reshape(B, S, H, DK).transpose(0, 2, 1, 3)
    kh = k.reshape(B, S, H, DK).transpose(0, 2, 1, 3)
    vh = v.reshape(B, S, H, DK).transpose(0, 2, 1, 3)
    s = jnp.einsum("bhqd,bhkd->bhqk", qh, kh) / math.sqrt(DK)
    m = src_mask[:, None, :, :]                   # (B,1,1,S)
    s = jnp.where(m == 0.0, -1e9, s)
    p = jax.nn.softmax(s, axis=-1)
    heads = jnp.einsum("bhqk,bhkd->bhqd", p, vh)
    concat = heads.transpose(0, 2, 1, 3).reshape(B, S, D)
    x1 = x + concat @ wo
    x1n = ln(x1, a2, g2)
    ff = jnp.maximum(x1n @ w1 + b1, 0.0) @ w2 + b2
    return x1 + ff


if __name__ == "__main__":
    key = jax.random.PRNGKey(0)
    ks = jax.random.split(key, 10)

    x = jax.random.normal(ks[0], (B, S, D), jnp.float32)
    # src_mask: (B, 1, S); mask out the last 2 key positions of batch 1.
    src_mask = jnp.ones((B, 1, S), jnp.float32)
    src_mask = src_mask.at[1, 0, -2:].set(0.0)

    def init(k, shape, fan_in):
        return jax.random.normal(k, shape, jnp.float32) / math.sqrt(fan_in)

    wq = init(ks[1], (D, D), D)
    wk = init(ks[2], (D, D), D)
    wv = init(ks[3], (D, D), D)
    wo = init(ks[4], (D, D), D)
    a1 = jnp.ones((1, D), jnp.float32)
    g1 = jnp.zeros((1, D), jnp.float32)
    a2 = jnp.ones((1, D), jnp.float32)
    g2 = jnp.zeros((1, D), jnp.float32)
    w1 = init(ks[5], (D, F), D)
    b1 = 0.01 * jax.random.normal(ks[6], (1, F), jnp.float32)
    w2 = init(ks[7], (F, D), F)
    b2 = 0.01 * jax.random.normal(ks[8], (1, D), jnp.float32)

    params = (wq, wk, wv, wo, a1, g1, a2, g2, w1, b1, w2, b2)
    packed = pack_params(params)          # one-time, outside the hot path

    out = jax.block_until_ready(encoder_block(x, src_mask, packed))
    ref = jax.block_until_ready(encoder_block_ref(x, src_mask, params))
    np.testing.assert_allclose(np.asarray(out), np.asarray(ref),
                               rtol=2e-2, atol=2e-2)

    print("KERNEL_OK")
</pallas_src>

<mosaic_0001>
module attributes {stable_mosaic.version = 11 : i64} {
  func.func @encoder_block_kernel(%arg0: memref<16x32xf32, #tpu.memory_space<vmem>>, %arg1: memref<1x16xf32, #tpu.memory_space<vmem>>, %arg2: memref<32x128xf32, #tpu.memory_space<vmem>>, %arg3: memref<32x128xf32, #tpu.memory_space<vmem>>, %arg4: memref<32x64xf32, #tpu.memory_space<vmem>>, %arg5: memref<64x32xf32, #tpu.memory_space<vmem>>, %arg6: memref<8x128xf32, #tpu.memory_space<vmem>>, %arg7: memref<16x32xf32, #tpu.memory_space<vmem>>) attributes {dimension_semantics = [], scalar_prefetch = 0 : i64, scratch_operands = 0 : i64, tpu.core_type = #tpu.core_type<tc>} {
    %c0 = arith.constant 0 : index
    %c0_0 = arith.constant 0 : index
    %0 = vector.load %arg0[%c0, %c0_0] : memref<16x32xf32, #tpu.memory_space<vmem>>, vector<16x32xf32>
    %c0_1 = arith.constant 0 : index
    %c0_2 = arith.constant 0 : index
    %1 = vector.load %arg6[%c0_1, %c0_2] : memref<8x128xf32, #tpu.memory_space<vmem>>, vector<1x32xf32>
    %c1 = arith.constant 1 : index
    %c0_3 = arith.constant 0 : index
    %2 = vector.load %arg6[%c1, %c0_3] : memref<8x128xf32, #tpu.memory_space<vmem>>, vector<1x32xf32>
    %c2 = arith.constant 2 : index
    %c0_4 = arith.constant 0 : index
    %3 = vector.load %arg6[%c2, %c0_4] : memref<8x128xf32, #tpu.memory_space<vmem>>, vector<1x32xf32>
    %c3 = arith.constant 3 : index
    %c0_5 = arith.constant 0 : index
    %4 = vector.load %arg6[%c3, %c0_5] : memref<8x128xf32, #tpu.memory_space<vmem>>, vector<1x32xf32>
    %c4 = arith.constant 4 : index
    %c0_6 = arith.constant 0 : index
    %5 = vector.load %arg6[%c4, %c0_6] : memref<8x128xf32, #tpu.memory_space<vmem>>, vector<1x32xf32>
    %c5 = arith.constant 5 : index
    %c0_7 = arith.constant 0 : index
    %6 = vector.load %arg6[%c5, %c0_7] : memref<8x128xf32, #tpu.memory_space<vmem>>, vector<1x64xf32>
    %7 = tpu.iota {dimensions = array<i32: 0>} : vector<16x16xi32>
    %8 = tpu.iota {dimensions = array<i32: 1>} : vector<16x16xi32>
    %c-8_i32 = arith.constant -8 : i32
    %9 = vector.broadcast %c-8_i32 : i32 to vector<16x16xi32>
    %10 = arith.andi %7, %9 : vector<16x16xi32>
    %c-8_i32_8 = arith.constant -8 : i32
    %11 = vector.broadcast %c-8_i32_8 : i32 to vector<16x16xi32>
    %12 = arith.andi %8, %11 : vector<16x16xi32>
    %13 = arith.cmpi eq, %10, %12 : vector<16x16xi32>
    %c0_9 = arith.constant 0 : index
    %c0_10 = arith.constant 0 : index
    %14 = vector.load %arg1[%c0_9, %c0_10] : memref<1x16xf32, #tpu.memory_space<vmem>>, vector<1x16xf32>
    %cst = arith.constant 0.000000e+00 : f32
    %15 = vector.broadcast %cst : f32 to vector<1x16xf32>
    %16 = arith.cmpf one, %14, %15 : vector<1x16xf32>
    %17 = vector.broadcast %16 : vector<1x16xi1> to vector<16x16xi1>
    %18 = arith.andi %13, %17 : vector<16x16xi1>
    %cst_11 = arith.constant 0.000000e+00 : f32
    %cst_12 = arith.constant -1.000000e+09 : f32
    %19 = vector.broadcast %cst_11 : f32 to vector<16x16xf32>
    %20 = vector.broadcast %cst_12 : f32 to vector<16x16xf32>
    %21 = arith.select %18, %19, %20 : vector<16x16xi1>, vector<16x16xf32>
    %cst_13 = arith.constant dense<0.000000e+00> : vector<16xf32>
    %22 = vector.multi_reduction <add>, %0, %cst_13 [1] : vector<16x32xf32> to vector<16xf32>
    %23 = vector.shape_cast %22 : vector<16xf32> to vector<16x1xf32>
    %cst_14 = arith.constant 3.200000e+01 : f32
    %24 = vector.broadcast %cst_14 : f32 to vector<16x1xf32>
    %25 = arith.divf %23, %24 : vector<16x1xf32>
    %26 = vector.broadcast %25 : vector<16x1xf32> to vector<16x32xf32>
    %27 = arith.subf %0, %26 : vector<16x32xf32>
    %28 = arith.mulf %27, %27 : vector<16x32xf32>
    %cst_15 = arith.constant dense<0.000000e+00> : vector<16xf32>
    %29 = vector.multi_reduction <add>, %28, %cst_15 [1] : vector<16x32xf32> to vector<16xf32>
    %30 = vector.shape_cast %29 : vector<16xf32> to vector<16x1xf32>
    %cst_16 = arith.constant 0.0322580636 : f32
    %31 = vector.broadcast %cst_16 : f32 to vector<16x1xf32>
    %32 = arith.mulf %30, %31 : vector<16x1xf32>
    %33 = math.sqrt %32 : vector<16x1xf32>
    %cst_17 = arith.constant 9.99999997E-7 : f32
    %34 = vector.broadcast %cst_17 : f32 to vector<16x1xf32>
    %35 = arith.addf %33, %34 : vector<16x1xf32>
    %36 = tpu.reciprocal %35 : vector<16x1xf32> -> vector<16x1xf32>
    %37 = vector.broadcast %36 : vector<16x1xf32> to vector<16x32xf32>
    %38 = arith.mulf %27, %37 : vector<16x32xf32>
    %39 = vector.broadcast %1 : vector<1x32xf32> to vector<16x32xf32>
    %40 = arith.mulf %39, %38 : vector<16x32xf32>
    %41 = vector.broadcast %2 : vector<1x32xf32> to vector<16x32xf32>
    %42 = arith.addf %40, %41 : vector<16x32xf32>
    %43 = tpu.transpose %42, [1, 0] : vector<16x32xf32> -> vector<32x16xf32>
    %c0_18 = arith.constant 0 : index
    %c0_19 = arith.constant 0 : index
    %44 = vector.load %arg2[%c0_18, %c0_19] : memref<32x128xf32, #tpu.memory_space<vmem>>, vector<32x128xf32>
    %cst_20 = arith.constant dense<0.000000e+00> : vector<16x128xf32>
    %45 = tpu.matmul %42, %44, %cst_20 {dimension_numbers = #tpu.dot_dimension_numbers<[1], [0], [0], [1], [0, 0, 1, 1], [], []>} : vector<16x32xf32>, vector<32x128xf32>, vector<16x128xf32> -> vector<16x128xf32>
    %c0_21 = arith.constant 0 : index
    %c0_22 = arith.constant 0 : index
    %46 = vector.load %arg3[%c0_21, %c0_22] : memref<32x128xf32, #tpu.memory_space<vmem>>, vector<32x128xf32>
    %cst_23 = arith.constant dense<0.000000e+00> : vector<16x128xf32>
    %47 = tpu.matmul %42, %46, %cst_23 {dimension_numbers = #tpu.dot_dimension_numbers<[1], [0], [0], [1], [0, 0, 1, 1], [], []>} : vector<16x32xf32>, vector<32x128xf32>, vector<16x128xf32> -> vector<16x128xf32>
    %cst_24 = arith.constant 0.000000e+00 : f32
    %48 = vector.broadcast %cst_24 : f32 to vector<16x32xf32>
    %49 = vector.extract_strided_slice %45 {offsets = [0, 0], sizes = [16, 32], strides = [1, 1]} : vector<16x128xf32> to vector<16x32xf32>
    %cst_25 = arith.constant dense<0.000000e+00> : vector<16x16xf32>
    %50 = tpu.matmul %49, %43, %cst_25 {dimension_numbers = #tpu.dot_dimension_numbers<[1], [0], [0], [1], [0, 0, 1, 1], [], []>} : vector<16x32xf32>, vector<32x16xf32>, vector<16x16xf32> -> vector<16x16xf32>
    %51 = arith.addf %50, %21 : vector<16x16xf32>
    %cst_26 = arith.constant dense<0xFF800000> : vector<16xf32>
    %52 = vector.multi_reduction <maximumf>, %51, %cst_26 [1] : vector<16x16xf32> to vector<16xf32>
    %53 = vector.shape_cast %52 : vector<16xf32> to vector<16x1xf32>
    %54 = vector.broadcast %53 : vector<16x1xf32> to vector<16x16xf32>
    %55 = arith.subf %51, %54 : vector<16x16xf32>
    %56 = math.exp %55 : vector<16x16xf32>
    %cst_27 = arith.constant dense<0.000000e+00> : vector<16xf32>
    %57 = vector.multi_reduction <add>, %56, %cst_27 [1] : vector<16x16xf32> to vector<16xf32>
    %58 = vector.shape_cast %57 : vector<16xf32> to vector<16x1xf32>
    %59 = tpu.reciprocal %58 : vector<16x1xf32> -> vector<16x1xf32>
    %60 = vector.broadcast %59 : vector<16x1xf32> to vector<16x16xf32>
    %61 = arith.mulf %56, %60 : vector<16x16xf32>
    %62 = vector.extract_strided_slice %47 {offsets = [0, 0], sizes = [16, 32], strides = [1, 1]} : vector<16x128xf32> to vector<16x32xf32>
    %cst_28 = arith.constant dense<0.000000e+00> : vector<16x32xf32>
    %63 = tpu.matmul %61, %62, %cst_28 {dimension_numbers = #tpu.dot_dimension_numbers<[1], [0], [0], [1], [0, 0, 1, 1], [], []>} : vector<16x16xf32>, vector<16x32xf32>, vector<16x32xf32> -> vector<16x32xf32>
    %64 = arith.addf %48, %63 : vector<16x32xf32>
    %65 = vector.extract_strided_slice %45 {offsets = [0, 32], sizes = [16, 32], strides = [1, 1]} : vector<16x128xf32> to vector<16x32xf32>
    %cst_29 = arith.constant dense<0.000000e+00> : vector<16x16xf32>
    %66 = tpu.matmul %65, %43, %cst_29 {dimension_numbers = #tpu.dot_dimension_numbers<[1], [0], [0], [1], [0, 0, 1, 1], [], []>} : vector<16x32xf32>, vector<32x16xf32>, vector<16x16xf32> -> vector<16x16xf32>
    %67 = arith.addf %66, %21 : vector<16x16xf32>
    %cst_30 = arith.constant dense<0xFF800000> : vector<16xf32>
    %68 = vector.multi_reduction <maximumf>, %67, %cst_30 [1] : vector<16x16xf32> to vector<16xf32>
    %69 = vector.shape_cast %68 : vector<16xf32> to vector<16x1xf32>
    %70 = vector.broadcast %69 : vector<16x1xf32> to vector<16x16xf32>
    %71 = arith.subf %67, %70 : vector<16x16xf32>
    %72 = math.exp %71 : vector<16x16xf32>
    %cst_31 = arith.constant dense<0.000000e+00> : vector<16xf32>
    %73 = vector.multi_reduction <add>, %72, %cst_31 [1] : vector<16x16xf32> to vector<16xf32>
    %74 = vector.shape_cast %73 : vector<16xf32> to vector<16x1xf32>
    %75 = tpu.reciprocal %74 : vector<16x1xf32> -> vector<16x1xf32>
    %76 = vector.broadcast %75 : vector<16x1xf32> to vector<16x16xf32>
    %77 = arith.mulf %72, %76 : vector<16x16xf32>
    %78 = vector.extract_strided_slice %47 {offsets = [0, 32], sizes = [16, 32], strides = [1, 1]} : vector<16x128xf32> to vector<16x32xf32>
    %cst_32 = arith.constant dense<0.000000e+00> : vector<16x32xf32>
    %79 = tpu.matmul %77, %78, %cst_32 {dimension_numbers = #tpu.dot_dimension_numbers<[1], [0], [0], [1], [0, 0, 1, 1], [], []>} : vector<16x16xf32>, vector<16x32xf32>, vector<16x32xf32> -> vector<16x32xf32>
    %80 = arith.addf %64, %79 : vector<16x32xf32>
    %81 = vector.extract_strided_slice %45 {offsets = [0, 64], sizes = [16, 32], strides = [1, 1]} : vector<16x128xf32> to vector<16x32xf32>
    %cst_33 = arith.constant dense<0.000000e+00> : vector<16x16xf32>
    %82 = tpu.matmul %81, %43, %cst_33 {dimension_numbers = #tpu.dot_dimension_numbers<[1], [0], [0], [1], [0, 0, 1, 1], [], []>} : vector<16x32xf32>, vector<32x16xf32>, vector<16x16xf32> -> vector<16x16xf32>
    %83 = arith.addf %82, %21 : vector<16x16xf32>
    %cst_34 = arith.constant dense<0xFF800000> : vector<16xf32>
    %84 = vector.multi_reduction <maximumf>, %83, %cst_34 [1] : vector<16x16xf32> to vector<16xf32>
    %85 = vector.shape_cast %84 : vector<16xf32> to vector<16x1xf32>
    %86 = vector.broadcast %85 : vector<16x1xf32> to vector<16x16xf32>
    %87 = arith.subf %83, %86 : vector<16x16xf32>
    %88 = math.exp %87 : vector<16x16xf32>
    %cst_35 = arith.constant dense<0.000000e+00> : vector<16xf32>
    %89 = vector.multi_reduction <add>, %88, %cst_35 [1] : vector<16x16xf32> to vector<16xf32>
    %90 = vector.shape_cast %89 : vector<16xf32> to vector<16x1xf32>
    %91 = tpu.reciprocal %90 : vector<16x1xf32> -> vector<16x1xf32>
    %92 = vector.broadcast %91 : vector<16x1xf32> to vector<16x16xf32>
    %93 = arith.mulf %88, %92 : vector<16x16xf32>
    %94 = vector.extract_strided_slice %47 {offsets = [0, 64], sizes = [16, 32], strides = [1, 1]} : vector<16x128xf32> to vector<16x32xf32>
    %cst_36 = arith.constant dense<0.000000e+00> : vector<16x32xf32>
    %95 = tpu.matmul %93, %94, %cst_36 {dimension_numbers = #tpu.dot_dimension_numbers<[1], [0], [0], [1], [0, 0, 1, 1], [], []>} : vector<16x16xf32>, vector<16x32xf32>, vector<16x32xf32> -> vector<16x32xf32>
    %96 = arith.addf %80, %95 : vector<16x32xf32>
    %97 = vector.extract_strided_slice %45 {offsets = [0, 96], sizes = [16, 32], strides = [1, 1]} : vector<16x128xf32> to vector<16x32xf32>
    %cst_37 = arith.constant dense<0.000000e+00> : vector<16x16xf32>
    %98 = tpu.matmul %97, %43, %cst_37 {dimension_numbers = #tpu.dot_dimension_numbers<[1], [0], [0], [1], [0, 0, 1, 1], [], []>} : vector<16x32xf32>, vector<32x16xf32>, vector<16x16xf32> -> vector<16x16xf32>
    %99 = arith.addf %98, %21 : vector<16x16xf32>
    %cst_38 = arith.constant dense<0xFF800000> : vector<16xf32>
    %100 = vector.multi_reduction <maximumf>, %99, %cst_38 [1] : vector<16x16xf32> to vector<16xf32>
    %101 = vector.shape_cast %100 : vector<16xf32> to vector<16x1xf32>
    %102 = vector.broadcast %101 : vector<16x1xf32> to vector<16x16xf32>
    %103 = arith.subf %99, %102 : vector<16x16xf32>
    %104 = math.exp %103 : vector<16x16xf32>
    %cst_39 = arith.constant dense<0.000000e+00> : vector<16xf32>
    %105 = vector.multi_reduction <add>, %104, %cst_39 [1] : vector<16x16xf32> to vector<16xf32>
    %106 = vector.shape_cast %105 : vector<16xf32> to vector<16x1xf32>
    %107 = tpu.reciprocal %106 : vector<16x1xf32> -> vector<16x1xf32>
    %108 = vector.broadcast %107 : vector<16x1xf32> to vector<16x16xf32>
    %109 = arith.mulf %104, %108 : vector<16x16xf32>
    %110 = vector.extract_strided_slice %47 {offsets = [0, 96], sizes = [16, 32], strides = [1, 1]} : vector<16x128xf32> to vector<16x32xf32>
    %cst_40 = arith.constant dense<0.000000e+00> : vector<16x32xf32>
    %111 = tpu.matmul %109, %110, %cst_40 {dimension_numbers = #tpu.dot_dimension_numbers<[1], [0], [0], [1], [0, 0, 1, 1], [], []>} : vector<16x16xf32>, vector<16x32xf32>, vector<16x32xf32> -> vector<16x32xf32>
    %112 = arith.addf %96, %111 : vector<16x32xf32>
    %113 = arith.addf %0, %112 : vector<16x32xf32>
    %cst_41 = arith.constant dense<0.000000e+00> : vector<16xf32>
    %114 = vector.multi_reduction <add>, %113, %cst_41 [1] : vector<16x32xf32> to vector<16xf32>
    %115 = vector.shape_cast %114 : vector<16xf32> to vector<16x1xf32>
    %cst_42 = arith.constant 3.200000e+01 : f32
    %116 = vector.broadcast %cst_42 : f32 to vector<16x1xf32>
    %117 = arith.divf %115, %116 : vector<16x1xf32>
    %118 = vector.broadcast %117 : vector<16x1xf32> to vector<16x32xf32>
    %119 = arith.subf %113, %118 : vector<16x32xf32>
    %120 = arith.mulf %119, %119 : vector<16x32xf32>
    %cst_43 = arith.constant dense<0.000000e+00> : vector<16xf32>
    %121 = vector.multi_reduction <add>, %120, %cst_43 [1] : vector<16x32xf32> to vector<16xf32>
    %122 = vector.shape_cast %121 : vector<16xf32> to vector<16x1xf32>
    %cst_44 = arith.constant 0.0322580636 : f32
    %123 = vector.broadcast %cst_44 : f32 to vector<16x1xf32>
    %124 = arith.mulf %122, %123 : vector<16x1xf32>
    %125 = math.sqrt %124 : vector<16x1xf32>
    %cst_45 = arith.constant 9.99999997E-7 : f32
    %126 = vector.broadcast %cst_45 : f32 to vector<16x1xf32>
    %127 = arith.addf %125, %126 : vector<16x1xf32>
    %128 = tpu.reciprocal %127 : vector<16x1xf32> -> vector<16x1xf32>
    %129 = vector.broadcast %128 : vector<16x1xf32> to vector<16x32xf32>
    %130 = arith.mulf %119, %129 : vector<16x32xf32>
    %131 = vector.broadcast %3 : vector<1x32xf32> to vector<16x32xf32>
    %132 = arith.mulf %131, %130 : vector<16x32xf32>
    %133 = vector.broadcast %4 : vector<1x32xf32> to vector<16x32xf32>
    %134 = arith.addf %132, %133 : vector<16x32xf32>
    %c0_46 = arith.constant 0 : index
    %c0_47 = arith.constant 0 : index
    %135 = vector.load %arg4[%c0_46, %c0_47] : memref<32x64xf32, #tpu.memory_space<vmem>>, vector<32x64xf32>
    %cst_48 = arith.constant dense<0.000000e+00> : vector<16x64xf32>
    %136 = tpu.matmul %134, %135, %cst_48 {dimension_numbers = #tpu.dot_dimension_numbers<[1], [0], [0], [1], [0, 0, 1, 1], [], []>} : vector<16x32xf32>, vector<32x64xf32>, vector<16x64xf32> -> vector<16x64xf32>
    %137 = vector.broadcast %6 : vector<1x64xf32> to vector<16x64xf32>
    %138 = arith.addf %136, %137 : vector<16x64xf32>
    %cst_49 = arith.constant 0.000000e+00 : f32
    %139 = vector.broadcast %cst_49 : f32 to vector<16x64xf32>
    %140 = arith.maximumf %138, %139 : vector<16x64xf32>
    %c0_50 = arith.constant 0 : index
    %c0_51 = arith.constant 0 : index
    %141 = vector.load %arg5[%c0_50, %c0_51] : memref<64x32xf32, #tpu.memory_space<vmem>>, vector<64x32xf32>
    %cst_52 = arith.constant dense<0.000000e+00> : vector<16x32xf32>
    %142 = tpu.matmul %140, %141, %cst_52 {dimension_numbers = #tpu.dot_dimension_numbers<[1], [0], [0], [1], [0, 0, 1, 1], [], []>} : vector<16x64xf32>, vector<64x32xf32>, vector<16x32xf32> -> vector<16x32xf32>
    %143 = vector.broadcast %5 : vector<1x32xf32> to vector<16x32xf32>
    %144 = arith.addf %142, %143 : vector<16x32xf32>
    %145 = arith.addf %113, %144 : vector<16x32xf32>
    %c0_53 = arith.constant 0 : index
    %c0_54 = arith.constant 0 : index
    %146 = vector.load %arg7[%c0_53, %c0_54] : memref<16x32xf32, #tpu.memory_space<vmem>>, vector<16x32xf32>
    tpu.vector_store %arg7[%c0_53, %c0_54], %145 {strides = array<i32>} : memref<16x32xf32, #tpu.memory_space<vmem>>, vector<16x32xf32>,
    return
  }
}

</mosaic_0001>

<bundles_post_ra>
// kernel: squeeze.1
= control target key start
LH: loop header
LB: loop body
LE: loop exit
PB: predicated region body
PF: predicated region fallthrough
CT: control target
= control target key end

     0   :  { %vm7_vm0 = vcmask 64512   ;;  %vm13_vm1 = vcmask 130112   ;;  %s39_s0 = inlined_call_operand.vmem [shape: f32[2,8], index: 0, kind: input, shape index: {}]   ;;  %s40_s1 = inlined_call_operand.vmem [shape: f32[1,16], index: 1, kind: output, shape index: {}]  }
   0x1   :  { %v4_v0 = vld [vmem:[%s39_s0] sm:$0x3]  ;;  %s22_s0 = smov 8  }
   0x2   :  { %5 = vst [vmem:[#allocation1] sm:$0x3] %v4_v0 }
   0x9   :  { %v10_v1 = vld [vmem:[#allocation1 + $0x1] sm:$0x1]   ;;  %v6_v2 = vld [vmem:[#allocation1] sm:$0x1]  }
   0xa   :  { %11 = vrot.lane.b32.xlu0 %v10_v1, %s22_s0  ;;  %8 = vst.msk [vmem:[#allocation0] sm:$0x1] %vm7_vm0, %v6_v2  }
  0x7c   :  { %v12_v3 = vpop.permute.xlu0 %11  }
  0x7d   :  { %14 = vst.msk [vmem:[#allocation0] sm:$0x1] %vm13_vm1, %v12_v3  }
  0x84   :  { %v18_v4 = vld [vmem:[#allocation0] sm:$0x1] }
  0x85   :  { %20 = vst [vmem:[%s40_s1] sm:$0x1] %v18_v4 }

// kernel: encoder_block.1
= control target key start
LH: loop header
LB: loop body
LE: loop exit
PB: predicated region body
PF: predicated region fallthrough
CT: control target
= control target key end

     0   :  { %12 = vsyncpa [#allocation3], 0  ;;  %s2050_s0 = inlined_call_operand.hbm [shape: f32[16,32], index: 0, kind: input, shape index: {}]   ;;  %s2051_s1 = inlined_call_operand.vmem [shape: f32[1,16], index: 1, kind: input, shape index: {}]   ;;  %s2052_s2 = inlined_call_operand.vmem [shape: f32[32,128], index: 2, kind: input, shape index: {}]   ;;  %s2053_s3 = inlined_call_operand.vmem [shape: f32[32,128], index: 3, kind: input, shape index: {}]   ;;  %s2054_s4 = inlined_call_operand.vmem [shape: f32[32,64], index: 4, kind: input, shape index: {}]   ;;  %s2055_s5 = inlined_call_operand.vmem [shape: f32[64,32], index: 5, kind: input, shape index: {}]   ;;  %s2056_s6 = inlined_call_operand.hbm [shape: f32[8,128], index: 6, kind: input, shape index: {}]   ;;  %s2057_s7 = inlined_call_operand.hbm [shape: f32[16,32], index: 7, kind: output, shape index: {}]  }
   0x1   :  { %13 = vsyncpa [#allocation6], 0 }
   0x2   :  { %14 = vsyncpa [#allocation4], 0  ;;  %s1766_s24 = smov [#allocation2]   ;;  %s1694_s28 = scalar_lea.hbm %s2050_s0, 256 }
   0x3   :  { %s20_s25 = sshll.u32 %s1766_s24, 4  ;;  %p1695_p0 = scmp.ne.s32.totalorder %s2050_s0, %s1694_s28  ;;  %s21_s25 = int_to_ptr.vmem [resolvable:$true] %s20_s25 }
   0x4   :  { %p1698_p1 = scmp.lt.u32.totalorder %s1694_s28, %s2050_s0 }
   0x6   :  { %p1700_p2 = pnand %p1698_p1, %p1695_p0 }
   0x8   :  { %1703 = shalt.err (!%p1700_p2)
}
   0x9   :  { %s1704_s10 = scalar_lea.vmem %s21_s25, 256  ;;  %p1709_p4 = scmp.lt.s32.totalorder %s21_s25, %s21_s25 }
   0xa   :  { %p1705_p3 = scmp.ne.s32.totalorder %s21_s25, %s1704_s10  ;;  %p1710_p5 = scmp.lt.s32.totalorder %s1704_s10, %s1704_s10 }
   0xc   :  { %p1711_p6 = por %p1710_p5, %p1709_p4 }
   0xe   :  { %p1712_p7 = pnand %p1711_p6, %p1705_p3 }
  0x10   :  { %1715 = shalt.err (!%p1712_p7)
}
  0x11   :  { %s1767_s11 = smov 128   ;;  %s1768_s12 = smov 8  }
  0x12   :  { %26 = dma.hbm_to_vmem [thread:$0]  %s2050_s0, 256, %s21_s25, [#allocation3], %s1767_s11, %s1767_s11, %s1768_s12  }
  0x13   :  { %s1769_s15 = smov [#allocation5]   ;;  %s1716_s19 = scalar_lea.hbm %s2056_s6, 128 }
  0x14   :  { %s43_s16 = sshll.u32 %s1769_s15, 4  ;;  %p1717_p8 = scmp.ne.s32.totalorder %s2056_s6, %s1716_s19  ;;  %s44_s16 = int_to_ptr.vmem [resolvable:$true] %s43_s16 }
  0x15   :  { %p1720_p9 = scmp.lt.u32.totalorder %s1716_s19, %s2056_s6 }
  0x17   :  { %p1722_p10 = pnand %p1720_p9, %p1717_p8 }
  0x19   :  { %1725 = shalt.err (!%p1722_p10)
}
  0x1a   :  { %s1726_s24 = scalar_lea.vmem %s44_s16, 128  ;;  %p1731_p12 = scmp.lt.s32.totalorder %s44_s16, %s44_s16 }
  0x1b   :  { %p1727_p11 = scmp.ne.s32.totalorder %s44_s16, %s1726_s24  ;;  %p1732_p13 = scmp.lt.s32.totalorder %s1726_s24, %s1726_s24 }
  0x1d   :  { %p1733_p0 = por %p1732_p13, %p1731_p12 }
  0x1f   :  { %p1734_p1 = pnand %p1733_p0, %p1727_p11 }
  0x21   :  { %1737 = shalt.err (!%p1734_p1)
}
  0x22   :  { %46 = dma.hbm_to_vmem [thread:$0]  %s2056_s6, 128, %s44_s16, [#allocation6]  }
  0x23   :  { %1760 = dma.done.wait [#allocation3], 256  }
  0x24   :  { %1761 = vsyncadd [#allocation3], 4294967040 }
  0x25   :  { %1762 = dma.done.wait [#allocation6], 128  }
  0x26   :  { %1763 = vsyncadd [#allocation6], 4294967168  ;;  %vm83_vm0 = vcmask 261120   ;;  %v1843_v0 = vld [vmem:[#allocation2] sm:$0xff]  ;;  %v1845_v1 = vld [vmem:[#allocation2 + $0x8] sm:$0xff]  ;;  %s1772_s20 = smov 32  }
  0x27   :  { %v84_v2 = vsel %vm83_vm0, %v1843_v0, 0.0  ;;  %v87_v3 = vsel %vm83_vm0, %v1845_v1, 0.0  ;;  %v137_v14 = vld [vmem:[%s2052_s2] sm:$0xff]  ;;  %v138_v15 = vld [vmem:[%s2052_s2 + $0x8] sm:$0xff]  ;;  %v139_v19 = vld [vmem:[%s2052_s2 + $0x10] sm:$0xff]  ;;  %vm382_vm12 = vcmask 130048  }
  0x28   :  { %85 = vadd.xlane.f32.xlu0 %v84_v2  ;;  %v222_v16 = vld [vmem:[%s2053_s3] sm:$0xff]  ;;  %v1535_v17 = vpack.c.bf16 %v138_v15, %v137_v14  ;;  %v223_v18 = vld [vmem:[%s2053_s3 + $0x8] sm:$0xff]  ;;  %v140_v20 = vld [vmem:[%s2052_s2 + $0x18] sm:$0xff]  ;;  %s1770_s2 = smov 96  }
  0x29   :  { %v1543_v21 = vpack.c.bf16 %v223_v18, %v222_v16  ;;  %v1539_v22 = vpack.c.bf16 %v140_v20, %v139_v19  ;;  %v224_v23 = vld [vmem:[%s2053_s3 + $0x10] sm:$0xff]  ;;  %v225_v24 = vld [vmem:[%s2053_s3 + $0x18] sm:$0xff]  ;;  %vm1883_vm5 = vmpackc.low %vm83_vm0, %vm83_vm0  ;;  %s1771_s3 = smov 64   ;;  %v1774_v18 = vmov -1e+09  }
  0x2a   :  { %1536 = vmatprep.subr.bf16.mxu0 %v1535_v17  ;;  %v1547_v25 = vpack.c.bf16 %v225_v24, %v224_v23  ;;  %v1329_v43 = vld [vmem:[#allocation5] ss:$0 sm:$0xff]  ;;  %v1330_v45 = vld [vmem:[#allocation5 + $0x1] ss:$0 sm:$0xff] }
  0x2b   :  { %1544 = vmatprep.subr.bf16.mxu1 %v1543_v21  ;;  %1538 = vmatpush3.bf16.msra.mxu0 %v1535_v17 }
  0x2c   :  { %88 = vadd.xlane.f32.xlu0 %v87_v3  ;;  %1546 = vmatpush3.bf16.msra.mxu1 %v1543_v21 }
  0x2d   :  { %1540 = vmatprep.subr.bf16.mxu0 %v1539_v22  ;;  %1548 = vmatprep.subr.bf16.mxu1 %v1547_v25 }
  0x2f   :  { %1542 = vmatpush3.bf16.msra.mxu0 %v1539_v22 }
  0x30   :  { %1550 = vmatpush3.bf16.msra.mxu1 %v1547_v25 }
  0xb5   :  { %v86_v4 = vpop.xlane.xlu0 %85 }
  0xb6   :  { %v91_v5 = vmul.f32 0.03125, %v86_v4 }
  0xb8   :  { %v93_v6 = vsub.f32 %v1843_v0, %v91_v5 }
  0xb9   :  { %v89_v7 = vpop.xlane.xlu0 %88 }
  0xba   :  { %v92_v8 = vmul.f32 0.03125, %v89_v7  ;;  %v95_v9 = vmul.f32 %v93_v6, %v93_v6  ;;  %v71_v7 = vld [vmem:[%s2051_s1] sm:$0x1] }
  0xbb   :  { %vm72_vm6 = vcmp.ne.f32.partialorder %v71_v7, 0.0 }
  0xbc   :  { %v94_v10 = vsub.f32 %v1845_v1, %v92_v8  ;;  %v97_v11 = vsel %vm83_vm0, %v95_v9, 0.0 }
  0xbd   :  { %98 = vadd.xlane.f32.xlu1 %v97_v11 }
  0xbe   :  { %v96_v12 = vmul.f32 %v94_v10, %v94_v10 }
  0xc0   :  { %v100_v13 = vsel %vm83_vm0, %v96_v12, 0.0  ;;  %v1773_v12 = vmov 0  }
  0xc1   :  { %101 = vadd.xlane.f32.xlu1 %v100_v13  ;;  %v73_v13 = vsel %vm72_vm6, 1, %v1773_v12 }
 0x14a   :  { %v99_v26 = vpop.xlane.xlu1 %98 }
 0x14b   :  { %v103_v27 = vmul.f32 0.032258064, %v99_v26 }
 0x14d   :  { %1646 = vrsqrt.f32 %v103_v27  ;;  %vm107_vm1 = vcmp.eq.f32.partialorder %v103_v27, inf  ;;  %v110_v32 = vand.u32 2147483648, %v103_v27  ;;  %vm109_vm2 = vcmp.eq.f32.partialorder %v103_v27, 0.0 }
 0x14e   :  { %v102_v28 = vpop.xlane.xlu1 %101 }
 0x14f   :  { %v104_v29 = vmul.f32 0.032258064, %v102_v28 }
 0x151   :  { %1648 = vrsqrt.f32 %v104_v29  ;;  %vm114_vm3 = vcmp.eq.f32.partialorder %v104_v29, inf  ;;  %v117_v38 = vand.u32 2147483648, %v104_v29  ;;  %vm116_vm4 = vcmp.eq.f32.partialorder %v104_v29, 0.0 }
 0x157   :  { %v1647_v30 = vpop.eup %1646 }
 0x158   :  { %v106_v31 = vmul.f32 %v1647_v30, %v103_v27 }
 0x15a   :  { %v108_v33 = vsel %vm107_vm1, %v103_v27, %v106_v31 }
 0x15b   :  { %v1649_v34 = vpop.eup %1648  ;;  %v111_v35 = vsel %vm109_vm2, %v110_v32, %v108_v33  ;;  %vm1225_vm2 = vcmask 523264  }
 0x15c   :  { %v113_v36 = vmul.f32 %v1649_v34, %v104_v29  ;;  %v119_v37 = vadd.f32 1e-06, %v111_v35 }
 0x15e   :  { %v115_v39 = vsel %vm114_vm3, %v104_v29, %v113_v36  ;;  %1650 = vrcp.f32 %v119_v37 }
 0x15f   :  { %v118_v40 = vsel %vm116_vm4, %v117_v38, %v115_v39 }
 0x160   :  { %v120_v41 = vadd.f32 1e-06, %v118_v40 }
 0x162   :  { %1652 = vrcp.f32 %v120_v41 }
 0x168   :  { %v1651_v42 = vpop.eup %1650 }
 0x169   :  { %v123_v44 = vmul.f32 %v1651_v42, %v93_v6  ;;  %v61_v6 = vlaneseq }
 0x16b   :  { %v129_v46 = vmul.f32 %v1329_v43, %v123_v44  ;;  %v62_v8 = vshrl.u32 %v61_v6, 7 }
 0x16c   :  { %v1653_v47 = vpop.eup %1652 }
 0x16d   :  { %v124_v48 = vmul.f32 %v1653_v47, %v94_v10  ;;  %v135_v49 = vadd.f32 %v1330_v45, %v129_v46  ;;  %v63_v9 = vadd.s32 8, %v62_v8  ;;  %v65_v10 = vand.u32 127, %v61_v6 }
 0x16e   :  { %v76_v11 = vsub.s32 0, %v62_v8  ;;  %v66_v17 = vand.u32 4294967288, %v62_v8 }
 0x16f   :  { %v130_v50 = vmul.f32 %v1329_v43, %v124_v48  ;;  %1435 = vmatprep.mubr.msk.f32.mxu0 %vm83_vm0, %v135_v49  ;;  %1446 = vmatprep.mubr.msk.f32.mxu1 %vm83_vm0, %v135_v49  ;;  %v67_v14 = vand.u32 4294967288, %v63_v9  ;;  %v68_v15 = vand.u32 4294967288, %v65_v10 }
 0x170   :  { %v77_v16 = vrot.slane %v73_v13, %v76_v11 }
 0x171   :  { %v136_v51 = vadd.f32 %v1330_v45, %v130_v50  ;;  %vm70_vm7 = vcmp.eq.s32.totalorder %v67_v14, %v68_v15  ;;  %vm69_vm9 = vcmp.eq.s32.totalorder %v66_v17, %v68_v15 }
 0x172   :  { %vm78_vm8 = vcmp.eq.s32.totalorder %v77_v16, 1 }
 0x173   :  { %v1551_v53 = vpack.c.bf16 %v136_v51, %v135_v49  ;;  %1436 = vmatmul.mubr.msk.f32.vlgmr.msra.gmra.mrb[0].mxu0 %vm83_vm0, %v136_v51  ;;  %1447 = vmatmul.mubr.msk.f32.vlgmr.msra.gmra.mrb[0].mxu1 %vm83_vm0, %v136_v51  ;;  %vm80_vm10 = vmand %vm70_vm7, %vm78_vm8 }
 0x174   :  { %vm79_vm11 = vmand %vm69_vm9, %vm78_vm8  ;;  %v82_v19 = vsel %vm80_vm10, 0.0, %v1774_v18 }
 0x175   :  { %1553 = vmatprep.subr.msk.bf16.mxu0 %vm1883_vm5, %v1551_v53  ;;  %1559 = vmatprep.subr.msk.bf16.mxu1 %vm1883_vm5, %v1551_v53  ;;  %v81_v21 = vsel %vm79_vm11, 0.0, %v1774_v18 }
 0x176   :  { %1556 = vmatpush3.bf16.xpose.msk.msra.mxu0 %vm1883_vm5, %v1551_v53  ;;  %1562 = vmatpush3.bf16.xpose.msk.msra.mxu1 %vm1883_vm5, %v1551_v53 }
 0x177   :  { %1573 = vmatprep.subr.msk.bf16.mxu1 %vm1883_vm5, %v1551_v53 }
 0x246   :  { %v1437_v54 = vpop.f32.mrb[0].mxu0  ;;  %v1448_v55 = vpop.f32.mrb[0].mxu1 }
 0x247   :  { %v292_v56 = vpop.f32.mrb[1].mxu1  ;;  %407 = vrot.lane.b32.xlu1 %v1437_v54, %s1770_s2  ;;  %v213_v57 = vpop.f32.mrb[1].mxu0 }
 0x248   :  { %405 = vrot.lane.b32.xlu0 %v213_v57, %s1770_s2  ;;  %1453 = vmatprep.mubr.msk.f32.mxu0 %vm83_vm0, %v213_v57  ;;  %v1902_v58 = vpack.i.bf16 %v1448_v55, %v292_v56  ;;  %v1905_v59 = vpack.c.bf16 %v1448_v55, %v292_v56 }
 0x249   :  { %1454 = vmatmul.mubr.msk.f32.vlgmr.msra.gmra.mrb[2].mxu0 %vm83_vm0, %v1437_v54 }
 0x24b   :  { %680 = vrot.lane.b32.xlu1 %v213_v57, %s1771_s3 }
 0x24c   :  { %874 = vrot.lane.b32.xlu0 %v213_v57, %s1772_s20 }
 0x24f   :  { %682 = vrot.lane.b32.xlu1 %v1437_v54, %s1771_s3 }
 0x253   :  { %876 = vrot.lane.b32.xlu1 %v1437_v54, %s1772_s20 }
 0x2b9   :  { %v408_v60 = vpop.permute.xlu1 %407 }
 0x2ba   :  { %v406_v61 = vpop.permute.xlu0 %405 }
 0x2bb   :  { %1460 = vmatprep.mubr.msk.f32.mxu1 %vm83_vm0, %v406_v61 }
 0x2bc   :  { %1461 = vmatmul.mubr.msk.f32.vlgmr.msra.gmra.mrb[2].mxu1 %vm83_vm0, %v408_v60 }
 0x2bd   :  { %1576 = vmatpush3.bf16.xpose.msk.msra.mxu1 %vm1883_vm5, %v1551_v53  ;;  %v681_v62 = vpop.permute.xlu1 %680 }
 0x2be   :  { %1583 = vmatprep.subr.msk.bf16.mxu1 %vm1883_vm5, %v1551_v53  ;;  %1481 = vmatprep.mubr.msk.f32.mxu1 %vm83_vm0, %v681_v62  ;;  %v875_v2 = vpop.permute.xlu0 %874 }
 0x2c1   :  { %v683_v63 = vpop.permute.xlu1 %682 }
 0x2c4   :  { %1482 = vmatmul.mubr.msk.f32.vlgmr.msra.gmra.mrb[4].mxu1 %vm83_vm0, %v683_v63 }
 0x2c5   :  { %1586 = vmatpush3.bf16.xpose.msk.msra.mxu1 %vm1883_vm5, %v1551_v53  ;;  %1495 = vmatprep.mubr.msk.f32.mxu1 %vm83_vm0, %v875_v2  ;;  %v877_v3 = vpop.permute.xlu1 %876 }
 0x2cc   :  { %1496 = vmatmul.mubr.msk.f32.vlgmr.msra.gmra.mrb[6].mxu1 %vm83_vm0, %v877_v3 }
 0x31c   :  { %v1455_v4 = vpop.f32.mrb[2].mxu0 }
 0x31d   :  { %v373_v5 = vpop.f32.mrb[3].mxu0  ;;  %v379_v28 = vadd.f32 %v1455_v4, %v82_v19 }
 0x31e   :  { %v374_v26 = vadd.f32 %v373_v5, %v81_v21 }
 0x31f   :  { %v386_v35 = vsel %vm382_vm12, %v379_v28, -inf }
 0x320   :  { %v383_v30 = vsel %vm382_vm12, %v374_v26, -inf }
 0x38f   :  { %v1462_v20 = vpop.f32.mrb[2].mxu1 }
 0x390   :  { %v485_v22 = vadd.f32 %v1462_v20, %v82_v19  ;;  %v479_v23 = vpop.f32.mrb[3].mxu1 }
 0x391   :  { %v480_v24 = vadd.f32 %v479_v23, %v81_v21 }
 0x392   :  { %v491_v25 = vsel %vm382_vm12, %v485_v22, -inf }
 0x393   :  { %492 = vmax.xlane.f32.xlu1 %v491_v25  ;;  %v488_v27 = vsel %vm382_vm12, %v480_v24, -inf }
 0x394   :  { %489 = vmax.xlane.f32.xlu0 %v488_v27 }
 0x397   :  { %v1483_v29 = vpop.f32.mrb[4].mxu1 }
 0x398   :  { %v760_v31 = vadd.f32 %v1483_v29, %v82_v19  ;;  %v754_v32 = vpop.f32.mrb[5].mxu1  ;;  %384 = vmax.xlane.f32.xlu0 %v383_v30 }
 0x399   :  { %v1930_v34 = vadd.f32 %v754_v32, %v81_v21 }
 0x39a   :  { %v766_v33 = vsel %vm382_vm12, %v760_v31, -inf }
 0x39b   :  { %767 = vmax.xlane.f32.xlu1 %v766_v33  ;;  %v763_v37 = vsel %vm382_vm12, %v1930_v34, -inf }
 0x39c   :  { %387 = vmax.xlane.f32.xlu0 %v386_v35 }
 0x39f   :  { %v1497_v36 = vpop.f32.mrb[6].mxu1 }
 0x3a0   :  { %v954_v38 = vadd.f32 %v1497_v36, %v82_v19  ;;  %v948_v39 = vpop.f32.mrb[7].mxu1  ;;  %764 = vmax.xlane.f32.xlu0 %v763_v37 }
 0x3a1   :  { %v949_v40 = vadd.f32 %v948_v39, %v81_v21 }
 0x3a2   :  { %v960_v41 = vsel %vm382_vm12, %v954_v38, -inf }
 0x3a3   :  { %961 = vmax.xlane.f32.xlu1 %v960_v41  ;;  %v957_v42 = vsel %vm382_vm12, %v949_v40, -inf }
 0x3a4   :  { %958 = vmax.xlane.f32.xlu0 %v957_v42 }
 0x420   :  { %v493_v45 = vpop.xlane.xlu1 %492 }
 0x421   :  { %v490_v43 = vpop.xlane.xlu0 %489  ;;  %v495_v48 = vsub.f32 %v485_v22, %v493_v45 }
 0x422   :  { %v494_v44 = vsub.f32 %v480_v24, %v490_v43 }
 0x423   :  { %v498_v54 = vmul.f32 1.442695, %v495_v48 }
 0x424   :  { %v496_v49 = vmul.f32 1.442695, %v494_v44 }
 0x425   :  { %v385_v46 = vpop.xlane.xlu0 %384 }
 0x426   :  { %v389_v47 = vsub.f32 %v374_v26, %v385_v46 }
 0x428   :  { %v391_v50 = vmul.f32 1.442695, %v389_v47  ;;  %v768_v51 = vpop.xlane.xlu1 %767 }
 0x429   :  { %v388_v52 = vpop.xlane.xlu0 %387  ;;  %v770_v55 = vsub.f32 %v760_v31, %v768_v51 }
 0x42a   :  { %1654 = vpow2.f32 %v391_v50  ;;  %v390_v53 = vsub.f32 %v379_v28, %v388_v52 }
 0x42b   :  { %1656 = vpow2.f32 %v496_v49  ;;  %v773_v60 = vmul.f32 1.442695, %v770_v55 }
 0x42c   :  { %v393_v56 = vmul.f32 1.442695, %v390_v53 }
 0x42d   :  { %v765_v57 = vpop.xlane.xlu0 %764 }
 0x42e   :  { %1658 = vpow2.f32 %v393_v56  ;;  %v769_v19 = vsub.f32 %v1930_v34, %v765_v57 }
 0x42f   :  { %1660 = vpow2.f32 %v498_v54 }
 0x430   :  { %v962_v61 = vpop.xlane.xlu1 %961  ;;  %1662 = vpow2.f32 %v773_v60  ;;  %v771_v20 = vmul.f32 1.442695, %v769_v19  ;;  %v1215_v19 = vld [vmem:[%s2055_s5 + $0x10] sm:$0xff] }
 0x431   :  { %v964_v62 = vsub.f32 %v954_v38, %v962_v61  ;;  %v959_v63 = vpop.xlane.xlu0 %958 }
 0x432   :  { %v963_v4 = vsub.f32 %v949_v40, %v959_v63 }
 0x433   :  { %v967_v3 = vmul.f32 1.442695, %v964_v62 }
 0x434   :  { %v1655_v2 = vpop.eup %1654  ;;  %v965_v8 = vmul.f32 1.442695, %v963_v4 }
 0x435   :  { %v395_v5 = vsel %vm382_vm12, %v1655_v2, 0.0  ;;  %v1657_v6 = vpop.eup %1656  ;;  %1664 = vpow2.f32 %v967_v3 }
 0x436   :  { %396 = vadd.xlane.f32.xlu0 %v395_v5  ;;  %v500_v9 = vsel %vm382_vm12, %v1657_v6, 0.0  ;;  %1666 = vpow2.f32 %v965_v8 }
 0x437   :  { %1668 = vpow2.f32 %v771_v20 }
 0x438   :  { %v1659_v7 = vpop.eup %1658 }
 0x439   :  { %v398_v10 = vsel %vm382_vm12, %v1659_v7, 0.0  ;;  %v1661_v11 = vpop.eup %1660 }
 0x43a   :  { %501 = vadd.xlane.f32.xlu0 %v500_v9  ;;  %399 = vadd.xlane.f32.xlu1 %v398_v10  ;;  %v503_v12 = vsel %vm382_vm12, %v1661_v11, 0.0  ;;  %v1941_v13 = vpop.eup %1662 }
 0x43b   :  { %v778_v14 = vsel %vm382_vm12, %v1941_v13, 0.0 }
 0x43e   :  { %504 = vadd.xlane.f32.xlu1 %v503_v12  ;;  %v1123_v12 = vld [vmem:[%s2054_s4 + $0x8] sm:$0xff] }
 0x43f   :  { %v1945_v15 = vpop.eup %1664 }
 0x440   :  { %v972_v16 = vsel %vm382_vm12, %v1945_v15, 0.0  ;;  %v1949_v17 = vpop.eup %1666 }
 0x441   :  { %v969_v18 = vsel %vm382_vm12, %v1949_v17, 0.0  ;;  %v1669_v21 = vpop.eup %1668 }
 0x442   :  { %779 = vadd.xlane.f32.xlu1 %v778_v14  ;;  %v775_v22 = vsel %vm382_vm12, %v1669_v21, 0.0 }
 0x446   :  { %973 = vadd.xlane.f32.xlu1 %v972_v16 }
 0x44a   :  { %970 = vadd.xlane.f32.xlu1 %v969_v18  ;;  %v1214_v18 = vld [vmem:[%s2055_s5 + $0x8] sm:$0xff] }
 0x450   :  { %1632 = vrot.lane.b32.xlu0 %v1902_v58, %s1770_s2 }
 0x45b   :  { %1637 = vrot.lane.b32.xlu1 %v1902_v58, %s1771_s3 }
 0x46f   :  { %776 = vadd.xlane.f32.xlu0 %v775_v22 }
 0x485   :  { %1642 = vrot.lane.b32.xlu0 %v1902_v58, %s1772_s20  ;;  %s1775_s20 = smov [#allocation7]  }
 0x486   :  { %s1316_s21 = sshll.u32 %s1775_s20, 4  ;;  %s1317_s21 = int_to_ptr.vmem [resolvable:$true] %s1316_s21 }
 0x487   :  { %p1743_p3 = scmp.lt.s32.totalorder %s1317_s21, %s1317_s21 }
 0x4c3   :  { %v397_v23 = vpop.xlane.xlu0 %396 }
 0x4c7   :  { %v400_v24 = vpop.xlane.xlu1 %399  ;;  %v502_v25 = vpop.xlane.xlu0 %501 }
 0x4c8   :  { %1670 = vrcp.f32 %v502_v25 }
 0x4c9   :  { %1672 = vrcp.f32 %v397_v23  ;;  %v1217_v23 = vld [vmem:[%s2055_s5 + $0x20] sm:$0xff] }
 0x4cb   :  { %v505_v26 = vpop.xlane.xlu1 %504  ;;  %v1633_v27 = vpop.permute.xlu0 %1632 }
 0x4cc   :  { %1674 = vrcp.f32 %v505_v26  ;;  %v1635_v28 = vunpack.i.h.bf16 %v1633_v27  ;;  %v1634_v29 = vunpack.i.l.bf16 %v1633_v27 }
 0x4cd   :  { %1676 = vrcp.f32 %v400_v24  ;;  %v1218_v24 = vld [vmem:[%s2055_s5 + $0x28] sm:$0xff] }
 0x4ce   :  { %v1563_v30 = vpack.c.bf16 %v1635_v28, %v1634_v29  ;;  %v1607_v25 = vpack.c.bf16 %v1218_v24, %v1217_v23 }
 0x4cf   :  { %v780_v31 = vpop.xlane.xlu1 %779 }
 0x4d0   :  { %1564 = vmatprep.subr.bf16.mxu0 %v1563_v30  ;;  %1678 = vrcp.f32 %v780_v31 }
 0x4d1   :  { %1566 = vmatpush3.bf16.msra.mxu0 %v1563_v30 }
 0x4d2   :  { %1568 = vmatprep.subr.bf16.mxu0 %v1905_v59  ;;  %v1671_v32 = vpop.eup %1670 }
 0x4d3   :  { %v974_v33 = vpop.xlane.xlu1 %973  ;;  %v508_v58 = vmul.f32 %v1671_v32, %v1657_v6  ;;  %v1673_v34 = vpop.eup %1672 }
 0x4d4   :  { %v403_v38 = vmul.f32 %v1673_v34, %v1655_v2 }
 0x4d5   :  { %1467 = vmatprep.mubr.msk.f32.mxu0 %vm382_vm12, %v508_v58 }
 0x4d6   :  { %v1675_v35 = vpop.eup %1674 }
 0x4d7   :  { %v509_v36 = vmul.f32 %v1675_v35, %v1661_v11  ;;  %v971_v37 = vpop.xlane.xlu1 %970  ;;  %v1677_v40 = vpop.eup %1676  ;;  %v1122_v11 = vld [vmem:[%s2054_s4] sm:$0xff] }
 0x4d8   :  { %v404_v44 = vmul.f32 %v1677_v40, %v1659_v7  ;;  %1680 = vrcp.f32 %v971_v37  ;;  %v1591_v14 = vpack.c.bf16 %v1123_v12, %v1122_v11 }
 0x4d9   :  { %1468 = vmatmul.mubr.msk.f32.vlgmr.msra.gmra.mrb[4].mxu0 %vm382_vm12, %v509_v36 }
 0x4da   :  { %1570 = vmatpush3.bf16.msra.mxu0 %v1905_v59  ;;  %1474 = vmatprep.mubr.msk.f32.mxu0 %vm382_vm12, %v403_v38  ;;  %v1679_v49 = vpop.eup %1678 }
 0x4db   :  { %v1638_v39 = vpop.permute.xlu1 %1637  ;;  %v784_v53 = vmul.f32 %v1679_v49, %v1941_v13  ;;  %v1124_v13 = vld [vmem:[%s2054_s4 + $0x10] sm:$0xff] }
 0x4dc   :  { %v1640_v41 = vunpack.i.h.bf16 %v1638_v39  ;;  %v1639_v42 = vunpack.i.l.bf16 %v1638_v39 }
 0x4de   :  { %v1577_v43 = vpack.c.bf16 %v1640_v41, %v1639_v42  ;;  %v1359_v42 = vld [vmem:[#allocation5 + $0x2] ss:$0 sm:$0xff] }
 0x4e0   :  { %1578 = vmatprep.subr.bf16.mxu0 %v1577_v43 }
 0x4e1   :  { %1475 = vmatmul.mubr.msk.f32.vlgmr.msra.gmra.mrb[4].mxu0 %vm382_vm12, %v404_v44  ;;  %v1360_v44 = vld [vmem:[#allocation5 + $0x3] ss:$0 sm:$0xff] }
 0x4e2   :  { %1580 = vmatpush3.bf16.msra.mxu0 %v1577_v43  ;;  %v1681_v50 = vpop.eup %1680 }
 0x4e3   :  { %v977_v54 = vmul.f32 %v1681_v50, %v1949_v17  ;;  %v1213_v17 = vld [vmem:[%s2055_s5] sm:$0xff]  ;;  %v1219_v50 = vld [vmem:[%s2055_s5 + $0x30] sm:$0xff] }
 0x4e4   :  { %v1599_v20 = vpack.c.bf16 %v1214_v18, %v1213_v17 }
 0x4e6   :  { %1600 = vmatprep.subr.bf16.mxu1 %v1599_v20 }
 0x4e7   :  { %1602 = vmatpush3.bf16.msra.mxu1 %v1599_v20 }
 0x4fc   :  { %v777_v45 = vpop.xlane.xlu0 %776 }
 0x4fd   :  { %1682 = vrcp.f32 %v777_v45 }
 0x4fe   :  { %1684 = vrcp.f32 %v974_v33 }
 0x500   :  { %v1643_v46 = vpop.permute.xlu0 %1642 }
 0x501   :  { %v1645_v47 = vunpack.i.h.bf16 %v1643_v46  ;;  %v1644_v48 = vunpack.i.l.bf16 %v1643_v46 }
 0x503   :  { %v1587_v59 = vpack.c.bf16 %v1645_v47, %v1644_v48 }
 0x505   :  { %1588 = vmatprep.subr.bf16.mxu0 %v1587_v59 }
 0x507   :  { %v1683_v51 = vpop.eup %1682 }
 0x508   :  { %v783_v52 = vmul.f32 %v1683_v51, %v1669_v21  ;;  %v1685_v55 = vpop.eup %1684  ;;  %v1216_v21 = vld [vmem:[%s2055_s5 + $0x18] sm:$0xff] }
 0x509   :  { %v978_v56 = vmul.f32 %v1685_v55, %v1945_v15  ;;  %v1125_v15 = vld [vmem:[%s2054_s4 + $0x18] sm:$0xff]  ;;  %v1603_v22 = vpack.c.bf16 %v1216_v21, %v1215_v19 }
 0x50a   :  { %1488 = vmatprep.mubr.msk.f32.mxu0 %vm382_vm12, %v783_v52  ;;  %v1595_v16 = vpack.c.bf16 %v1125_v15, %v1124_v13  ;;  %v1220_v51 = vld [vmem:[%s2055_s5 + $0x38] sm:$0xff]  ;;  %s1738_s5 = scalar_lea.vmem %s1317_s21, 256 }
 0x50b   :  { %1489 = vmatmul.mubr.msk.f32.vlgmr.msra.gmra.mrb[4].mxu0 %vm382_vm12, %v784_v53  ;;  %1604 = vmatprep.subr.bf16.mxu1 %v1603_v22  ;;  %v1611_v52 = vpack.c.bf16 %v1220_v51, %v1219_v50  ;;  %v1361_v53 = vld [vmem:[#allocation5 + $0x5] ss:$0 sm:$0xff]  ;;  %p1739_p2 = scmp.ne.s32.totalorder %s1317_s21, %s1738_s5  ;;  %p1744_p4 = scmp.lt.s32.totalorder %s1738_s5, %s1738_s5 }
 0x50c   :  { %1590 = vmatpush3.bf16.msra.mxu0 %v1587_v59  ;;  %1502 = vmatprep.mubr.msk.f32.mxu0 %vm382_vm12, %v977_v54 }
 0x50d   :  { %1592 = vmatprep.subr.bf16.mxu0 %v1591_v14  ;;  %1606 = vmatpush3.bf16.msra.mxu1 %v1603_v22  ;;  %p1745_p5 = por %p1744_p4, %p1743_p3 }
 0x50e   :  { %1608 = vmatprep.subr.bf16.mxu1 %v1607_v25 }
 0x50f   :  { %p1746_p6 = pnand %p1745_p5, %p1739_p2 }
 0x511   :  { %1610 = vmatpush3.bf16.msra.mxu1 %v1607_v25 }
 0x512   :  { %1612 = vmatprep.subr.bf16.mxu1 %v1611_v52 }
 0x513   :  { %1503 = vmatmul.mubr.msk.f32.vlgmr.msra.gmra.mrb[4].mxu0 %vm382_vm12, %v978_v56 }
 0x514   :  { %1594 = vmatpush3.bf16.msra.mxu0 %v1591_v14 }
 0x515   :  { %1596 = vmatprep.subr.bf16.mxu0 %v1595_v16  ;;  %1614 = vmatpush3.bf16.msra.mxu1 %v1611_v52 }
 0x518   :  { %1598 = vmatpush3.bf16.msra.mxu0 %v1595_v16 }
 0x5e6   :  { %v1504_v57 = vpop.f32.mrb[4].mxu0 }
 0x5e7   :  { %v1975_v60 = vadd.f32 %v1504_v57, %v1845_v1  ;;  %v1057_v61 = vpop.f32.mrb[5].mxu0 }
 0x5e8   :  { %v1978_v62 = vadd.f32 %v1057_v61, %v1843_v0 }
 0x5e9   :  { %v1073_v63 = vsel %vm83_vm0, %v1975_v60, 0.0 }
 0x5ea   :  { %1074 = vadd.xlane.f32.xlu0 %v1073_v63  ;;  %v1070_v2 = vsel %vm83_vm0, %v1978_v62, 0.0 }
 0x5eb   :  { %1071 = vadd.xlane.f32.xlu1 %v1070_v2  ;;  %v1364_v2 = vld [vmem:[#allocation5 + $0x4] ss:$0 sm:$0xff] }
 0x677   :  { %v1075_v3 = vpop.xlane.xlu0 %1074 }
 0x678   :  { %v1077_v4 = vmul.f32 0.03125, %v1075_v3  ;;  %v1072_v5 = vpop.xlane.xlu1 %1071 }
 0x679   :  { %v1076_v6 = vmul.f32 0.03125, %v1072_v5 }
 0x67a   :  { %v1985_v7 = vsub.f32 %v1975_v60, %v1077_v4 }
 0x67b   :  { %v1078_v1 = vsub.f32 %v1978_v62, %v1076_v6 }
 0x67c   :  { %v1081_v9 = vmul.f32 %v1985_v7, %v1985_v7 }
 0x67d   :  { %v1080_v8 = vmul.f32 %v1078_v1, %v1078_v1 }
 0x67e   :  { %v1085_v10 = vsel %vm83_vm0, %v1081_v9, 0.0 }
 0x67f   :  { %v1082_v0 = vsel %vm83_vm0, %v1080_v8, 0.0 }
 0x680   :  { %1083 = vadd.xlane.f32.xlu0 %v1082_v0 }
 0x684   :  { %1086 = vadd.xlane.f32.xlu0 %v1085_v10 }
 0x70d   :  { %v1084_v26 = vpop.xlane.xlu0 %1083 }
 0x70e   :  { %v1088_v27 = vmul.f32 0.032258064, %v1084_v26 }
 0x710   :  { %1686 = vrsqrt.f32 %v1088_v27  ;;  %vm1092_vm13 = vcmp.eq.f32.partialorder %v1088_v27, inf  ;;  %v1095_v32 = vand.u32 2147483648, %v1088_v27  ;;  %vm1094_vm14 = vcmp.eq.f32.partialorder %v1088_v27, 0.0 }
 0x711   :  { %v1087_v28 = vpop.xlane.xlu0 %1086 }
 0x712   :  { %v1089_v29 = vmul.f32 0.032258064, %v1087_v28 }
 0x714   :  { %1688 = vrsqrt.f32 %v1089_v29  ;;  %vm1099_vm15 = vcmp.eq.f32.partialorder %v1089_v29, inf  ;;  %v1102_v37 = vand.u32 2147483648, %v1089_v29  ;;  %vm1101_vm1 = vcmp.eq.f32.partialorder %v1089_v29, 0.0 }
 0x71a   :  { %v1687_v30 = vpop.eup %1686 }
 0x71b   :  { %v1091_v31 = vmul.f32 %v1687_v30, %v1088_v27 }
 0x71d   :  { %v1093_v33 = vsel %vm1092_vm13, %v1088_v27, %v1091_v31 }
 0x71e   :  { %v1689_v58 = vpop.eup %1688  ;;  %v1096_v34 = vsel %vm1094_vm14, %v1095_v32, %v1093_v33 }
 0x71f   :  { %v1104_v35 = vadd.f32 1e-06, %v1096_v34  ;;  %v1098_v36 = vmul.f32 %v1689_v58, %v1089_v29 }
 0x721   :  { %1690 = vrcp.f32 %v1104_v35  ;;  %v1100_v38 = vsel %vm1099_vm15, %v1089_v29, %v1098_v36 }
 0x722   :  { %v1103_v39 = vsel %vm1101_vm1, %v1102_v37, %v1100_v38 }
 0x723   :  { %v1105_v40 = vadd.f32 1e-06, %v1103_v39 }
 0x725   :  { %1692 = vrcp.f32 %v1105_v40 }
 0x72b   :  { %v1691_v41 = vpop.eup %1690 }
 0x72c   :  { %v1108_v43 = vmul.f32 %v1691_v41, %v1078_v1 }
 0x72e   :  { %v1114_v45 = vmul.f32 %v1359_v42, %v1108_v43 }
 0x72f   :  { %v1693_v46 = vpop.eup %1692 }
 0x730   :  { %v1109_v47 = vmul.f32 %v1693_v46, %v1985_v7  ;;  %v1120_v48 = vadd.f32 %v1360_v44, %v1114_v45 }
 0x732   :  { %v1115_v59 = vmul.f32 %v1359_v42, %v1109_v47  ;;  %1513 = vmatprep.mubr.msk.f32.mxu0 %vm83_vm0, %v1120_v48 }
 0x734   :  { %v1121_v49 = vadd.f32 %v1360_v44, %v1115_v59 }
 0x736   :  { %1514 = vmatmul.mubr.msk.f32.vlgmr.msra.gmra.mrb[6].mxu0 %vm83_vm0, %v1121_v49 }
 0x809   :  { %v1515_v54 = vpop.f32.mrb[6].mxu0 }
 0x80a   :  { %v1208_v55 = vadd.f32 %v1515_v54, %v1361_v53  ;;  %v1202_v56 = vpop.f32.mrb[7].mxu0 }
 0x80b   :  { %v1203_v57 = vadd.f32 %v1361_v53, %v1202_v56 }
 0x80c   :  { %v1212_v63 = vmax.f32 %v1208_v55, 0.0 }
 0x80d   :  { %v1211_v61 = vmax.f32 %v1203_v57, 0.0 }
 0x80f   :  { %1532 = vmatprep.mubr.msk.f32.mxu1 %vm1225_vm2, %v1211_v61 }
 0x810   :  { %1533 = vmatmul.mubr.msk.f32.vlgmr.msra.gmra.mrb[8].mxu1 %vm1225_vm2, %v1212_v63 }
 0x8e3   :  { %v1534_v3 = vpop.f32.mrb[8].mxu1 }
 0x8e4   :  { %v1304_v4 = vadd.f32 %v1534_v3, %v1364_v2  ;;  %v1298_v5 = vpop.f32.mrb[9].mxu1 }
 0x8e5   :  { %v1299_v6 = vadd.f32 %v1364_v2, %v1298_v5 }
 0x8e6   :  { %v1308_v7 = vadd.f32 %v1304_v4, %v1975_v60 }
 0x8e7   :  { %v1307_v1 = vadd.f32 %v1299_v6, %v1978_v62 }
 0x8e8   :  { %1310 = vst.msk [vmem:[#allocation7 + $0x8] sm:$0xff] %vm83_vm0, %v1308_v7 }
 0x8e9   :  { %1309 = vst.msk [vmem:[#allocation7] sm:$0xff] %vm83_vm0, %v1307_v1 }
 0x8ea   :  { %1749 = shalt.err (!%p1746_p6)
}
 0x8eb   :  { %s1750_s23 = scalar_lea.hbm %s2057_s7, 256 }
 0x8ec   :  { %p1751_p7 = scmp.ne.s32.totalorder %s2057_s7, %s1750_s23  ;;  %p1754_p8 = scmp.lt.u32.totalorder %s1750_s23, %s2057_s7 }
 0x8ee   :  { %p1756_p9 = pnand %p1754_p8, %p1751_p7 }
 0x8f0   :  { %1759 = shalt.err (!%p1756_p9)
}
 0x8f1   :  { %1322 = dma.vmem_to_hbm [thread:$0]  %s1317_s21, 256, %s2057_s7, [#allocation4], %s1767_s11, %s1767_s11, %s1768_s12  }
 0x8f2   :  { %1764 = dma.done.wait [#allocation4], 256  }
 0x8f3   :  { %1765 = vsyncadd [#allocation4], 4294967040 }
 0x8f4   :  { %1326 = vsyncpa [#allocation3], 1 }
 0x8f5   :  { %1327 = vsyncpa [#allocation6], 1 }
 0x8f6   :  { %1328 = vsyncpa [#allocation4], 1 }

</bundles_post_ra>
